<compile_context>
chip_gen: v6e
topology: v6e:2x2x1
jax: 0.10.0
libtpu: 0.0.40
codegen_flags: <defaults>
</compile_context>

<pallas_src>
import functools

import jax
import jax.numpy as jnp
from jax import lax
from jax.experimental import pallas as pl
from jax.experimental.pallas import tpu as pltpu
import numpy as np


def _pick_tm(H, W):
    """Tile height in flattened rows: TM = k*W, k | H, TM % 8 == 0, >= 2 tiles."""
    best = None
    for k in range(1, H):                 # k < H  =>  at least 2 tiles
        if H % k:
            continue
        tm = k * W
        if tm % 8:
            continue
        if tm > 1024:
            break
        best = tm
    if best is None:
        # TODO(synk): pad ragged HW (19x19, 5x5, 3x3) up to a tileable size instead
        # of falling back to a single whole-image tile (nT=1 kills pipelining).
        return H * W
    return best


def _ssd_head_kernel(x_ref, ml_ref, mr_ref, dw_ref, shift_ref, pw_w_ref, pw_b_ref,
                     out_ref, *, W, C, TM):
    """Grid = (batch, spatial tile).  Everything is per-tile; no carried state.

    x_ref     : (HW + 2W, C)  flattened NHWC activation with W zero rows top/bottom
    ml_ref    : (TM, 1) f32   column gate: 1.0 where w >= 1       (left neighbour valid)
    mr_ref    : (TM, 1) f32   column gate: 1.0 where w <= W-2     (right neighbour valid)
    dw_ref    : (9, C)        depthwise 3x3 weights, BN scale folded in
    shift_ref : (1, C)        fused BN shift (beta - mean*scale)
    pw_w_ref  : (C, AT)       1x1 conv weights
    pw_b_ref  : (1, AT)       1x1 conv bias
    out_ref   : (1, TM, AT)   output tile (AT-wide, no lane padding in HBM)
    """
    t = pl.program_id(1)
    base = pl.multiple_of(t * TM, TM)

    # Three row bands (dh = -1, 0, +1).  The zero rows padded above/below the image
    # provide the row halo, so no row-border masks are needed.
    up = x_ref[pl.ds(base, TM), :]
    mid = x_ref[pl.ds(base + W, TM), :]
    dn = x_ref[pl.ds(base + 2 * W, TM), :]

    dw = dw_ref[...]                              # (9, C)

    def w_at(r, c):                               # tap weight, kernel row r / col c
        return dw[3 * r + c].reshape(1, C)

    # Column-partial sums: fold the three row taps per column offset first (9 muls),
    # then shift the +-1 column partials by one flattened row (XLU rolls) and gate.
    cp_l = up * w_at(0, 0) + mid * w_at(1, 0) + dn * w_at(2, 0)
    cp_c = up * w_at(0, 1) + mid * w_at(1, 1) + dn * w_at(2, 1)
    cp_r = up * w_at(0, 2) + mid * w_at(1, 2) + dn * w_at(2, 2)

    left = pltpu.roll(cp_l, shift=1, axis=0)        # left[i]  = cp_l[i-1]
    right = pltpu.roll(cp_r, shift=TM - 1, axis=0)  # right[i] = cp_r[i+1]
    # TM is a multiple of W, so the roll wrap rows have w==0 / w==W-1 and are gated.

    y = cp_c + ml_ref[...] * left + mr_ref[...] * right
    y = jnp.clip(y + shift_ref[...], 0.0, 6.0)      # fused BN shift + ReLU6

    # 1x1 conv == MXU matmul straight from vregs; output stays AT-wide.
    res = jnp.dot(y, pw_w_ref[...], preferred_element_type=jnp.float32)
    out_ref[0] = (res + pw_b_ref[...]).astype(out_ref.dtype)


def ssd_head_forward(x_nchw, params, *, num_anchors, task_len):
    """x_nchw: (N, C, H, W) float32. Returns (N, H*W*num_anchors, task_len)."""
    N, C, H, W = x_nchw.shape
    HW = H * W
    AT = num_anchors * task_len

    # Fold BN (eval mode, eps=0.001) into scale/shift; fold scale into the weights.
    eps = 1e-3
    scale = params["bn_gamma"] / jnp.sqrt(params["bn_var"] + eps)      # (C,)
    shift = params["bn_beta"] - params["bn_mean"] * scale              # (C,)
    dw_w9 = (params["dw_w"] * scale[None, None, :]).reshape(9, C)      # (9, C)
    shift2 = shift.reshape(1, C)
    pw_w = params["pw_w"]                                              # (C, AT)
    pw_b = params["pw_b"].reshape(1, AT)

    # Pad one zero row of H on each side BEFORE the NHWC transpose (fuses with that
    # pass), giving W zero rows above/below the flattened (HW, C) image.
    # TODO(synk): an NHWC-native producer would remove the transpose pass entirely.
    x_pad = jnp.pad(x_nchw, ((0, 0), (0, 0), (1, 1), (0, 0)))
    HWp = (H + 2) * W
    x_flat = jnp.transpose(x_pad, (0, 2, 3, 1)).reshape(N, HWp, C)

    TM = _pick_tm(H, W)
    nT = HW // TM

    # Column-border gates (tile-invariant because TM % W == 0).
    wloc = np.arange(TM, dtype=np.int64) % W
    mask_l = jnp.asarray((wloc >= 1).astype(np.float32).reshape(TM, 1))
    mask_r = jnp.asarray((wloc <= W - 2).astype(np.float32).reshape(TM, 1))

    kernel = functools.partial(_ssd_head_kernel, W=W, C=C, TM=TM)

    # (8,128)-layout-aware VMEM budget: last dim -> 128, second-to-last -> 8,
    # x2 for double buffering, plus headroom for the phase-1 temporaries.
    def _pad_bytes(rows, cols, itemsize=4):
        r8 = ((max(rows, 1) + 7) // 8) * 8
        c128 = ((max(cols, 1) + 127) // 128) * 128
        return r8 * c128 * itemsize

    blk_bytes = sum(_pad_bytes(r, c) for (r, c) in
                    [(HWp, C), (TM, 1), (TM, 1), (9, C), (1, C), (C, AT), (1, AT),
                     (TM, AT)])
    est = 2 * blk_bytes + 10 * _pad_bytes(TM, C) + 2 * _pad_bytes(TM, AT)
    vmem_limit = int(min(max(est + (4 << 20), 16 << 20), 32 << 20))

    out = pl.pallas_call(
        kernel,
        out_shape=jax.ShapeDtypeStruct((N, HW, AT), jnp.float32),
        grid_spec=pltpu.PrefetchScalarGridSpec(
            num_scalar_prefetch=0,
            grid=(N, nT),
            in_specs=[
                pl.BlockSpec((None, HWp, C), lambda b, t: (b, 0, 0)),  # resident per batch
                pl.BlockSpec((TM, 1), lambda b, t: (0, 0)),
                pl.BlockSpec((TM, 1), lambda b, t: (0, 0)),
                pl.BlockSpec((9, C), lambda b, t: (0, 0)),
                pl.BlockSpec((1, C), lambda b, t: (0, 0)),
                pl.BlockSpec((C, AT), lambda b, t: (0, 0)),
                pl.BlockSpec((1, AT), lambda b, t: (0, 0)),
            ],
            out_specs=pl.BlockSpec((1, TM, AT), lambda b, t: (b, t, 0)),
        ),
        compiler_params=pltpu.CompilerParams(
            dimension_semantics=("parallel", "parallel"),
            vmem_limit_bytes=vmem_limit,
        ),
    )(x_flat, mask_l, mask_r, dw_w9, shift2, pw_w, pw_b)

    # (N, HW, AT) -> (N, HW*A, T): free row-major reshape (no slice pass).
    return out.reshape(N, HW * num_anchors, task_len)


def ssd_head_reference(x_nchw, params, *, num_anchors, task_len):
    """Pure-JAX (lax.conv) reference mirroring the PyTorch module."""
    N, C, H, W = x_nchw.shape
    eps = 1e-3
    # Depthwise 3x3 conv, groups=C, no bias. OIHW weights: (C, 1, 3, 3).
    dw_oihw = jnp.transpose(params["dw_w"], (2, 0, 1))[:, None, :, :]
    y = lax.conv_general_dilated(
        x_nchw, dw_oihw, window_strides=(1, 1), padding=((1, 1), (1, 1)),
        feature_group_count=C,
        dimension_numbers=("NCHW", "OIHW", "NCHW"),
        precision=lax.Precision.HIGHEST)
    # BatchNorm (eval) + ReLU6.
    scale = params["bn_gamma"] / jnp.sqrt(params["bn_var"] + eps)
    shift = params["bn_beta"] - params["bn_mean"] * scale
    y = y * scale[None, :, None, None] + shift[None, :, None, None]
    y = jnp.clip(y, 0.0, 6.0)
    # 1x1 conv with bias. OIHW: (AT, C, 1, 1).
    pw_oihw = jnp.transpose(params["pw_w"], (1, 0))[:, :, None, None]
    y = lax.conv_general_dilated(
        y, pw_oihw, window_strides=(1, 1), padding=((0, 0), (0, 0)),
        dimension_numbers=("NCHW", "OIHW", "NCHW"),
        precision=lax.Precision.HIGHEST)
    y = y + params["pw_b"][None, :, None, None]
    y = jnp.transpose(y, (0, 2, 3, 1)).reshape(N, -1, task_len)
    return y


if __name__ == "__main__":
    # Small shapes consistent with SSDHead: batch=2, c=32, spatial=16x16,
    # num_anchors=4, task_len=6  ->  output (2, 16*16*4, 6) = (2, 1024, 6).
    N, C, H, W = 2, 32, 16, 16
    num_anchors, task_len = 4, 6
    AT = num_anchors * task_len

    key = jax.random.PRNGKey(0)
    k = jax.random.split(key, 7)
    x = jax.random.normal(k[0], (N, C, H, W), jnp.float32)

    params = {
        # depthwise conv weights stored HWC: (3, 3, C)
        "dw_w": 0.2 * jax.random.normal(k[1], (3, 3, C), jnp.float32),
        # BatchNorm2d(C, eps=0.001) params / running stats
        "bn_gamma": 1.0 + 0.1 * jax.random.normal(k[2], (C,), jnp.float32),
        "bn_beta": 0.1 * jax.random.normal(k[3], (C,), jnp.float32),
        "bn_mean": 0.05 * jax.random.normal(k[4], (C,), jnp.float32),
        "bn_var": jnp.abs(0.5 * jax.random.normal(k[5], (C,), jnp.float32)) + 0.5,
        # 1x1 conv as matmul weights (C, A*T) + bias
        "pw_w": 0.2 * jax.random.normal(k[6], (C, AT), jnp.float32),
        "pw_b": jnp.linspace(-0.1, 0.1, AT, dtype=jnp.float32),
    }

    out = ssd_head_forward(x, params, num_anchors=num_anchors, task_len=task_len)
    out = jax.block_until_ready(out)

    ref = ssd_head_reference(x, params, num_anchors=num_anchors, task_len=task_len)
    ref = jax.block_until_ready(ref)

    assert out.shape == (N, H * W * num_anchors, task_len), out.shape
    np.testing.assert_allclose(np.asarray(out), np.asarray(ref), rtol=1e-4, atol=1e-4)

    print("KERNEL_OK")
</pallas_src>

<mosaic_0001>
module attributes {stable_mosaic.version = 11 : i64} {
  func.func @_ssd_head_kernel(%arg0: i32, %arg1: i32, %arg2: memref<1x288x32xf32, #tpu.memory_space<vmem>>, %arg3: memref<128x1xf32, #tpu.memory_space<vmem>>, %arg4: memref<128x1xf32, #tpu.memory_space<vmem>>, %arg5: memref<9x32xf32, #tpu.memory_space<vmem>>, %arg6: memref<1x32xf32, #tpu.memory_space<vmem>>, %arg7: memref<32x24xf32, #tpu.memory_space<vmem>>, %arg8: memref<1x24xf32, #tpu.memory_space<vmem>>, %arg9: memref<1x128x24xf32, #tpu.memory_space<vmem>>) attributes {dimension_semantics = [#tpu.dimension_semantics<parallel>, #tpu.dimension_semantics<parallel>], iteration_bounds = array<i64: 2, 2>, scalar_prefetch = 0 : i64, scratch_operands = 0 : i64, tpu.core_type = #tpu.core_type<tc>, window_params = [{transform_indices = @transform_0, window_bounds = array<i64: 1, 288, 32>}, {pipeline_mode = #tpu.pipeline_mode<synchronous>, transform_indices = @transform_1, window_bounds = array<i64: 128, 1>}, {pipeline_mode = #tpu.pipeline_mode<synchronous>, transform_indices = @transform_2, window_bounds = array<i64: 128, 1>}, {pipeline_mode = #tpu.pipeline_mode<synchronous>, transform_indices = @transform_3, window_bounds = array<i64: 9, 32>}, {pipeline_mode = #tpu.pipeline_mode<synchronous>, transform_indices = @transform_4, window_bounds = array<i64: 1, 32>}, {pipeline_mode = #tpu.pipeline_mode<synchronous>, transform_indices = @transform_5, window_bounds = array<i64: 32, 24>}, {pipeline_mode = #tpu.pipeline_mode<synchronous>, transform_indices = @transform_6, window_bounds = array<i64: 1, 24>}, {transform_indices = @transform_7, window_bounds = array<i64: 1, 128, 24>}]} {
    %c128_i32 = arith.constant 128 : i32
    %0 = arith.muli %arg1, %c128_i32 : i32
    %1 = tpu.assume_multiple %0, 128 : i32
    %c0 = arith.constant 0 : index
    %2 = arith.index_cast %1 : i32 to index
    %c0_0 = arith.constant 0 : index
    %3 = vector.load %arg2[%c0, %2, %c0_0] : memref<1x288x32xf32, #tpu.memory_space<vmem>>, vector<1x128x32xf32>
    %4 = vector.shape_cast %3 : vector<1x128x32xf32> to vector<128x32xf32>
    %c16_i32 = arith.constant 16 : i32
    %5 = arith.addi %1, %c16_i32 : i32
    %c0_1 = arith.constant 0 : index
    %6 = arith.index_cast %5 : i32 to index
    %c0_2 = arith.constant 0 : index
    %7 = vector.load %arg2[%c0_1, %6, %c0_2] : memref<1x288x32xf32, #tpu.memory_space<vmem>>, vector<1x128x32xf32>
    %8 = vector.shape_cast %7 : vector<1x128x32xf32> to vector<128x32xf32>
    %c32_i32 = arith.constant 32 : i32
    %9 = arith.addi %1, %c32_i32 : i32
    %c0_3 = arith.constant 0 : index
    %10 = arith.index_cast %9 : i32 to index
    %c0_4 = arith.constant 0 : index
    %11 = vector.load %arg2[%c0_3, %10, %c0_4] : memref<1x288x32xf32, #tpu.memory_space<vmem>>, vector<1x128x32xf32>
    %12 = vector.shape_cast %11 : vector<1x128x32xf32> to vector<128x32xf32>
    %c0_5 = arith.constant 0 : index
    %c0_6 = arith.constant 0 : index
    %13 = vector.load %arg5[%c0_5, %c0_6] : memref<9x32xf32, #tpu.memory_space<vmem>>, vector<9x32xf32>
    %14 = vector.extract_strided_slice %13 {offsets = [0, 0], sizes = [1, 32], strides = [1, 1]} : vector<9x32xf32> to vector<1x32xf32>
    %15 = vector.shape_cast %14 : vector<1x32xf32> to vector<32xf32>
    %16 = vector.shape_cast %15 : vector<32xf32> to vector<1x32xf32>
    %17 = vector.broadcast %16 : vector<1x32xf32> to vector<128x32xf32>
    %18 = arith.mulf %4, %17 : vector<128x32xf32>
    %19 = vector.extract_strided_slice %13 {offsets = [3, 0], sizes = [1, 32], strides = [1, 1]} : vector<9x32xf32> to vector<1x32xf32>
    %20 = vector.shape_cast %19 : vector<1x32xf32> to vector<32xf32>
    %21 = vector.shape_cast %20 : vector<32xf32> to vector<1x32xf32>
    %22 = vector.broadcast %21 : vector<1x32xf32> to vector<128x32xf32>
    %23 = arith.mulf %8, %22 : vector<128x32xf32>
    %24 = arith.addf %18, %23 : vector<128x32xf32>
    %25 = vector.extract_strided_slice %13 {offsets = [6, 0], sizes = [1, 32], strides = [1, 1]} : vector<9x32xf32> to vector<1x32xf32>
    %26 = vector.shape_cast %25 : vector<1x32xf32> to vector<32xf32>
    %27 = vector.shape_cast %26 : vector<32xf32> to vector<1x32xf32>
    %28 = vector.broadcast %27 : vector<1x32xf32> to vector<128x32xf32>
    %29 = arith.mulf %12, %28 : vector<128x32xf32>
    %30 = arith.addf %24, %29 : vector<128x32xf32>
    %31 = vector.extract_strided_slice %13 {offsets = [1, 0], sizes = [1, 32], strides = [1, 1]} : vector<9x32xf32> to vector<1x32xf32>
    %32 = vector.shape_cast %31 : vector<1x32xf32> to vector<32xf32>
    %33 = vector.shape_cast %32 : vector<32xf32> to vector<1x32xf32>
    %34 = vector.broadcast %33 : vector<1x32xf32> to vector<128x32xf32>
    %35 = arith.mulf %4, %34 : vector<128x32xf32>
    %36 = vector.extract_strided_slice %13 {offsets = [4, 0], sizes = [1, 32], strides = [1, 1]} : vector<9x32xf32> to vector<1x32xf32>
    %37 = vector.shape_cast %36 : vector<1x32xf32> to vector<32xf32>
    %38 = vector.shape_cast %37 : vector<32xf32> to vector<1x32xf32>
    %39 = vector.broadcast %38 : vector<1x32xf32> to vector<128x32xf32>
    %40 = arith.mulf %8, %39 : vector<128x32xf32>
    %41 = arith.addf %35, %40 : vector<128x32xf32>
    %42 = vector.extract_strided_slice %13 {offsets = [7, 0], sizes = [1, 32], strides = [1, 1]} : vector<9x32xf32> to vector<1x32xf32>
    %43 = vector.shape_cast %42 : vector<1x32xf32> to vector<32xf32>
    %44 = vector.shape_cast %43 : vector<32xf32> to vector<1x32xf32>
    %45 = vector.broadcast %44 : vector<1x32xf32> to vector<128x32xf32>
    %46 = arith.mulf %12, %45 : vector<128x32xf32>
    %47 = arith.addf %41, %46 : vector<128x32xf32>
    %48 = vector.extract_strided_slice %13 {offsets = [2, 0], sizes = [1, 32], strides = [1, 1]} : vector<9x32xf32> to vector<1x32xf32>
    %49 = vector.shape_cast %48 : vector<1x32xf32> to vector<32xf32>
    %50 = vector.shape_cast %49 : vector<32xf32> to vector<1x32xf32>
    %51 = vector.broadcast %50 : vector<1x32xf32> to vector<128x32xf32>
    %52 = arith.mulf %4, %51 : vector<128x32xf32>
    %53 = vector.extract_strided_slice %13 {offsets = [5, 0], sizes = [1, 32], strides = [1, 1]} : vector<9x32xf32> to vector<1x32xf32>
    %54 = vector.shape_cast %53 : vector<1x32xf32> to vector<32xf32>
    %55 = vector.shape_cast %54 : vector<32xf32> to vector<1x32xf32>
    %56 = vector.broadcast %55 : vector<1x32xf32> to vector<128x32xf32>
    %57 = arith.mulf %8, %56 : vector<128x32xf32>
    %58 = arith.addf %52, %57 : vector<128x32xf32>
    %59 = vector.extract_strided_slice %13 {offsets = [8, 0], sizes = [1, 32], strides = [1, 1]} : vector<9x32xf32> to vector<1x32xf32>
    %60 = vector.shape_cast %59 : vector<1x32xf32> to vector<32xf32>
    %61 = vector.shape_cast %60 : vector<32xf32> to vector<1x32xf32>
    %62 = vector.broadcast %61 : vector<1x32xf32> to vector<128x32xf32>
    %63 = arith.mulf %12, %62 : vector<128x32xf32>
    %64 = arith.addf %58, %63 : vector<128x32xf32>
    %c1_i32 = arith.constant 1 : i32
    %65 = tpu.dynamic_rotate %30 by %c1_i32 dim 0 : vector<128x32xf32>, i32 -> vector<128x32xf32>
    %c127_i32 = arith.constant 127 : i32
    %66 = tpu.dynamic_rotate %64 by %c127_i32 dim 0 : vector<128x32xf32>, i32 -> vector<128x32xf32>
    %c0_7 = arith.constant 0 : index
    %c0_8 = arith.constant 0 : index
    %67 = vector.load %arg3[%c0_7, %c0_8] : memref<128x1xf32, #tpu.memory_space<vmem>>, vector<128x1xf32>
    %68 = vector.broadcast %67 : vector<128x1xf32> to vector<128x32xf32>
    %69 = arith.mulf %68, %65 : vector<128x32xf32>
    %70 = arith.addf %47, %69 : vector<128x32xf32>
    %c0_9 = arith.constant 0 : index
    %c0_10 = arith.constant 0 : index
    %71 = vector.load %arg4[%c0_9, %c0_10] : memref<128x1xf32, #tpu.memory_space<vmem>>, vector<128x1xf32>
    %72 = vector.broadcast %71 : vector<128x1xf32> to vector<128x32xf32>
    %73 = arith.mulf %72, %66 : vector<128x32xf32>
    %74 = arith.addf %70, %73 : vector<128x32xf32>
    %c0_11 = arith.constant 0 : index
    %c0_12 = arith.constant 0 : index
    %75 = vector.load %arg6[%c0_11, %c0_12] : memref<1x32xf32, #tpu.memory_space<vmem>>, vector<1x32xf32>
    %76 = vector.broadcast %75 : vector<1x32xf32> to vector<128x32xf32>
    %77 = arith.addf %74, %76 : vector<128x32xf32>
    %cst = arith.constant 0.000000e+00 : f32
    %cst_13 = arith.constant 6.000000e+00 : f32
    %78 = vector.broadcast %cst : f32 to vector<128x32xf32>
    %79 = arith.maximumf %78, %77 : vector<128x32xf32>
    %80 = vector.broadcast %cst_13 : f32 to vector<128x32xf32>
    %81 = arith.minimumf %80, %79 : vector<128x32xf32>
    %c0_14 = arith.constant 0 : index
    %c0_15 = arith.constant 0 : index
    %82 = vector.load %arg7[%c0_14, %c0_15] : memref<32x24xf32, #tpu.memory_space<vmem>>, vector<32x24xf32>
    %cst_16 = arith.constant dense<0.000000e+00> : vector<128x24xf32>
    %83 = tpu.matmul %81, %82, %cst_16 {dimension_numbers = #tpu.dot_dimension_numbers<[1], [0], [0], [1], [0, 0, 1, 1], [], []>} : vector<128x32xf32>, vector<32x24xf32>, vector<128x24xf32> -> vector<128x24xf32>
    %c0_17 = arith.constant 0 : index
    %c0_18 = arith.constant 0 : index
    %84 = vector.load %arg8[%c0_17, %c0_18] : memref<1x24xf32, #tpu.memory_space<vmem>>, vector<1x24xf32>
    %85 = vector.broadcast %84 : vector<1x24xf32> to vector<128x24xf32>
    %86 = arith.addf %83, %85 : vector<128x24xf32>
    %c0_19 = arith.constant 0 : index
    %c0_20 = arith.constant 0 : index
    %c0_21 = arith.constant 0 : index
    %87 = vector.load %arg9[%c0_19, %c0_20, %c0_21] : memref<1x128x24xf32, #tpu.memory_space<vmem>>, vector<1x128x24xf32>
    %88 = vector.shape_cast %87 : vector<1x128x24xf32> to vector<128x24xf32>
    %89 = vector.shape_cast %86 : vector<128x24xf32> to vector<1x128x24xf32>
    tpu.vector_store %arg9[%c0_19, %c0_20, %c0_21], %89 {strides = array<i32>} : memref<1x128x24xf32, #tpu.memory_space<vmem>>, vector<1x128x24xf32>,
    return
  }
  func.func @transform_0(%arg0: i32, %arg1: i32) -> (i32, i32, i32) {
    %c0_i32 = arith.constant 0 : i32
    %c0_i32_0 = arith.constant 0 : i32
    %c0_i32_1 = arith.constant 0 : i32
    return %arg0, %c0_i32, %c0_i32_0 : i32, i32, i32
  }
  func.func @transform_1(%arg0: i32, %arg1: i32) -> (i32, i32) {
    %c0_i32 = arith.constant 0 : i32
    %c0_i32_0 = arith.constant 0 : i32
    %c0_i32_1 = arith.constant 0 : i32
    return %c0_i32, %c0_i32_0 : i32, i32
  }
  func.func @transform_2(%arg0: i32, %arg1: i32) -> (i32, i32) {
    %c0_i32 = arith.constant 0 : i32
    %c0_i32_0 = arith.constant 0 : i32
    %c0_i32_1 = arith.constant 0 : i32
    return %c0_i32, %c0_i32_0 : i32, i32
  }
  func.func @transform_3(%arg0: i32, %arg1: i32) -> (i32, i32) {
    %c0_i32 = arith.constant 0 : i32
    %c0_i32_0 = arith.constant 0 : i32
    %c0_i32_1 = arith.constant 0 : i32
    return %c0_i32, %c0_i32_0 : i32, i32
  }
  func.func @transform_4(%arg0: i32, %arg1: i32) -> (i32, i32) {
    %c0_i32 = arith.constant 0 : i32
    %c0_i32_0 = arith.constant 0 : i32
    %c0_i32_1 = arith.constant 0 : i32
    return %c0_i32, %c0_i32_0 : i32, i32
  }
  func.func @transform_5(%arg0: i32, %arg1: i32) -> (i32, i32) {
    %c0_i32 = arith.constant 0 : i32
    %c0_i32_0 = arith.constant 0 : i32
    %c0_i32_1 = arith.constant 0 : i32
    return %c0_i32, %c0_i32_0 : i32, i32
  }
  func.func @transform_6(%arg0: i32, %arg1: i32) -> (i32, i32) {
    %c0_i32 = arith.constant 0 : i32
    %c0_i32_0 = arith.constant 0 : i32
    %c0_i32_1 = arith.constant 0 : i32
    return %c0_i32, %c0_i32_0 : i32, i32
  }
  func.func @transform_7(%arg0: i32, %arg1: i32) -> (i32, i32, i32) {
    %c0_i32 = arith.constant 0 : i32
    %c0_i32_0 = arith.constant 0 : i32
    return %arg0, %arg1, %c0_i32 : i32, i32, i32
  }
}

</mosaic_0001>

<bundles_post_ra>
// kernel: tpu_custom_call.1
= control target key start
LH: loop header
LB: loop body
LE: loop exit
PB: predicated region body
PF: predicated region fallthrough
CT: control target
= control target key end

     0   :  { %s1577_s24 = smov 0   ;;  %s1579_s25 = smov 0   ;;  %s2519_s0 = inlined_call_operand.vmem [shape: f32[2,288,32], index: 0, kind: input, shape index: {}]   ;;  %s2520_s1 = inlined_call_operand.vmem [shape: f32[128,1], index: 1, kind: input, shape index: {}]   ;;  %s2521_s2 = inlined_call_operand.vmem [shape: f32[128,1], index: 2, kind: input, shape index: {}]   ;;  %s2522_s3 = inlined_call_operand.vmem [shape: f32[9,32], index: 3, kind: input, shape index: {}]   ;;  %s2523_s4 = inlined_call_operand.vmem [shape: f32[1,32], index: 4, kind: input, shape index: {}]   ;;  %s2524_s5 = inlined_call_operand.vmem [shape: f32[32,24], index: 5, kind: input, shape index: {}]   ;;  %s2525_s6 = inlined_call_operand.vmem [shape: f32[1,24], index: 6, kind: input, shape index: {}]   ;;  %s2526_s7 = inlined_call_operand.vmem [shape: f32[2,256,24], index: 7, kind: output, shape index: {}]  }
   0x1   :  { %s1581_s26 = smov 0   ;;  %s1583_s27 = smov 0  }
   0x2   :  { %s1585_s28 = smov 0  }
   0x3 LB: > { %s26_s29 = sadd.s32 1, %s1526_s26  ;;  %s29_s30 = sadd.s32 1, %s1530_s27  ;;  %s1534_s28 = sphi %s1585_s28, %s17_s28   ;;  %s1530_s27 = sphi %s1583_s27, %s2612_s27   ;;  %s1526_s26 = sphi %s1581_s26, %s2611_s26   ;;  %s1522_s25 = sphi %s1579_s25, %s2610_s25   ;;  %s1518_s24 = sphi %s1577_s24, %s2609_s24  }
   0x4   : > { %p27_p0 = scmp.ge.s32.totalorder %s26_s29, 2  ;;  %p1331_p1 = scmp.ge.s32.totalorder %s1534_s28, 1 }
   0x5   : > { %p251_p2 = scmp.lt.s32.totalorder %s1534_s28, 5 }
   0x6   : > { %s2614_s29 = smov (%p27_p0, %s26_s29), 0  ;;  %s2616_s30 = smov (!%p27_p0, %s29_s30), %s1530_s27 }
   0x7   : > { %p252_p3 = pnand %p1331_p1, %p251_p2  ;;  %p31_p4 = scmp.ge.s32.totalorder %s2616_s30, 2 }
   0x9   : > { %s2618_s30 = smov (%p31_p4, %s2616_s30), 0  ;;  %255 = sbr.rel (%p252_p3) target bundleno = 408 (0x198), region = 48 }
   0xe   : > { %v703_v0 = vld [vmem:[%s2520_s1 + $0x8] sm:$0xff]  ;;  %v702_v1 = vld [vmem:[%s2520_s1] sm:$0xff]  ;;  %v1536_v2 = vmov 0   ;;  %v712_v9 = vld [vmem:[%s2520_s1 + $0x50] sm:$0xff]  ;;  %p287_p5 = scmp.lt.s32.totalorder %s1522_s25, 1  ;;  %v358_v35 = vlaneseq  ;;  %s1336_s20 = sshll.u32 %s1518_s24, 7 }
   0xf   : > { %1495 = vset.pattern.permute.xlu1 %v1536_v2  ;;  %1494 = vset.pattern.permute.xlu0 %v1536_v2  ;;  %v711_v3 = vld [vmem:[%s2520_s1 + $0x48] sm:$0xff]  ;;  %v710_v4 = vld [vmem:[%s2520_s1 + $0x40] sm:$0xff]  ;;  %v704_v10 = vld [vmem:[%s2520_s1 + $0x10] sm:$0xff]  ;;  %vm1024_vm2 = vcmask 261120   ;;  %s1333_s12 = sshll.u32 %s1518_s24, 4  ;;  %vm1218_vm3 = vcmask 195584  }
  0x10   : > { %725 = vperm.xlu1 %1495, %v703_v0   ;;  %720 = vperm.xlu0 %1494, %v702_v1   ;;  %v838_v5 = vld [vmem:[%s2521_s2 + $0x40] sm:$0xff]  ;;  %v839_v7 = vld [vmem:[%s2521_s2 + $0x48] sm:$0xff]  ;;  %v1016_v11 = vld [vmem:[%s2524_s5 + $0x18] sm:$0xff]  ;;  %s2620_s25 = smov (!%p287_p5, %s1522_s25), 1  ;;  %v1724_v38 = vshrl.u32 %v358_v35, 7  ;;  %p295_p6 = scmp.lt.s32.totalorder %s1333_s12, 31 }
  0x11   : > { %v830_v6 = vld [vmem:[%s2521_s2] sm:$0xff]  ;;  %v831_v8 = vld [vmem:[%s2521_s2 + $0x8] sm:$0xff]  ;;  %v713_v12 = vld [vmem:[%s2520_s1 + $0x58] sm:$0xff]  ;;  %1412 = vmatprep.subr.mxu0 %v1016_v11  ;;  %1444 = vmatprep.subr.mxu1 %v1016_v11  ;;  %s1452_s16 = smul.u32 288, %s2620_s25  ;;  %s1334_s13 = sshll.u32 %s2620_s25, 5 }
  0x12   : > { %v705_v13 = vld [vmem:[%s2520_s1 + $0x18] sm:$0xff]  ;;  %v1015_v14 = vld [vmem:[%s2524_s5 + $0x10] sm:$0xff]  ;;  %1413 = vmatpush3.msra.mxu0 %v1016_v11  ;;  %1448 = vmatpush3.msra.mxu1 %v1016_v11  ;;  %v1014_v17 = vld [vmem:[%s2524_s5 + $0x8] sm:$0xff]  ;;  %v360_v39 = vsub.s32 0, %v1724_v38  ;;  %v380_v40 = vsub.s32 3, %v1724_v38  ;;  %v416_v42 = vsub.s32 6, %v1724_v38 }
  0x13   : > { %v840_v15 = vld [vmem:[%s2521_s2 + $0x50] sm:$0xff]  ;;  %1414 = vmatprep.subr.mxu0 %v1015_v14  ;;  %1445 = vmatprep.subr.mxu1 %v1015_v14  ;;  %v841_v18 = vld [vmem:[%s2521_s2 + $0x58] sm:$0xff]  ;;  %v1013_v20 = vld [vmem:[%s2524_s5] sm:$0xff]  ;;  %s291_s19 = scalar_lea.vmem %s2519_s0, %s1452_s16  ;;  %v452_v50 = vsub.s32 1, %v1724_v38  ;;  %v472_v51 = vsub.s32 4, %v1724_v38  ;;  %v508_v60 = vsub.s32 7, %v1724_v38 }
  0x14   : > { %765 = vperm.xlu1 %1495, %v711_v3   ;;  %760 = vperm.xlu0 %1494, %v710_v4   ;;  %v832_v16 = vld [vmem:[%s2521_s2 + $0x10] sm:$0xff]  ;;  %v833_v19 = vld [vmem:[%s2521_s2 + $0x18] sm:$0xff]  ;;  %v714_v21 = vld [vmem:[%s2520_s1 + $0x60] sm:$0xff]  ;;  %s1732_s21 = scalar_lea.vmem %s291_s19, %s1336_s20  ;;  %vm652_vm0 = vcmp.lt.s32.totalorder %v1724_v38, 1  ;;  %vm685_vm1 = vcmp.lt.s32.totalorder %v1724_v38, 7  ;;  %s2622_s12 = smov (!%p295_p6, %s1333_s12), 31 }
  0x15   : > { %1415 = vmatpush3.msra.mxu0 %v1015_v14  ;;  %1449 = vmatpush3.msra.mxu1 %v1015_v14  ;;  %v706_v22 = vld [vmem:[%s2520_s1 + $0x20] sm:$0xff]  ;;  %v715_v23 = vld [vmem:[%s2520_s1 + $0x68] sm:$0xff]  ;;  %v716_v29 = vld [vmem:[%s2520_s1 + $0x70] sm:$0xff]  ;;  %s298_s14 = sadd.s32 %s1334_s13, %s2622_s12 }
  0x16   : > { %1416 = vmatprep.subr.mxu0 %v1014_v17  ;;  %1446 = vmatprep.subr.mxu1 %v1014_v17  ;;  %v707_v24 = vld [vmem:[%s2520_s1 + $0x28] sm:$0xff]  ;;  %v842_v25 = vld [vmem:[%s2521_s2 + $0x60] sm:$0xff]  ;;  %v708_v30 = vld [vmem:[%s2520_s1 + $0x30] sm:$0xff]  ;;  %s1335_s15 = sshll.u32 %s298_s14, 3 }
  0x17   : > { %1417 = vmatpush3.msra.mxu0 %v1014_v17  ;;  %1450 = vmatpush3.msra.mxu1 %v1014_v17  ;;  %v834_v26 = vld [vmem:[%s2521_s2 + $0x20] sm:$0xff]  ;;  %v843_v27 = vld [vmem:[%s2521_s2 + $0x68] sm:$0xff]  ;;  %v717_v31 = vld [vmem:[%s2520_s1 + $0x78] sm:$0xff]  ;;  %s2470_s20 = scalar_lea.vmem %s2526_s7, %s1335_s15 }
  0x18   : > { %888 = vperm.xlu1 %1495, %v838_v5   ;;  %848 = vperm.xlu0 %1494, %v830_v6   ;;  %v835_v28 = vld [vmem:[%s2521_s2 + $0x28] sm:$0xff]  ;;  %v709_v32 = vld [vmem:[%s2520_s1 + $0x38] sm:$0xff]  ;;  %v844_v33 = vld [vmem:[%s2521_s2 + $0x70] sm:$0xff] }
  0x19   : > { %1418 = vmatprep.subr.mxu0 %v1013_v20  ;;  %1447 = vmatprep.subr.mxu1 %v1013_v20  ;;  %v836_v34 = vld [vmem:[%s2521_s2 + $0x30] sm:$0xff]  ;;  %v845_v36 = vld [vmem:[%s2521_s2 + $0x78] sm:$0xff]  ;;  %v356_v41 = vld [vmem:[%s2522_s3] sm:$0xff] }
  0x1a   : > { %1419 = vmatpush3.msra.mxu0 %v1013_v20  ;;  %1451 = vmatpush3.msra.mxu1 %v1013_v20  ;;  %v837_v37 = vld [vmem:[%s2521_s2 + $0x38] sm:$0xff]  ;;  %v1739_v43 = vld [vmem:[%s1732_s21] sm:$0xff]  ;;  %v1741_v44 = vrot.slane %v356_v41, %v360_v39  ;;  %v1743_v45 = vrot.slane %v356_v41, %v380_v40  ;;  %v1746_v46 = vld [vmem:[%s1732_s21 + $0x8] sm:$0xff]  ;;  %v1754_v49 = vrot.slane %v356_v41, %v416_v42 }
  0x1b   : > { %v1749_v47 = vld [vmem:[%s1732_s21 + $0x10] sm:$0xff]  ;;  %v1752_v48 = vld [vmem:[%s1732_s21 + $0x18] sm:$0xff]  ;;  %v1767_v56 = vld [vmem:[%s1732_s21 + $0x20] sm:$0xff]  ;;  %v1772_v58 = vrot.slane %v356_v41, %v452_v50  ;;  %v1774_v59 = vrot.slane %v356_v41, %v472_v51  ;;  %v1791_v5 = vrot.slane %v356_v41, %v508_v60 }
  0x1c   : > { %893 = vperm.xlu1 %1495, %v839_v7   ;;  %853 = vperm.xlu0 %1494, %v831_v8   ;;  %v362_v52 = vmul.f32 %v1741_v44, %v1739_v43  ;;  %v363_v53 = vmul.f32 %v1741_v44, %v1746_v46  ;;  %v382_v54 = vmul.f32 %v1749_v47, %v1743_v45  ;;  %v1770_v57 = vld [vmem:[%s1732_s21 + $0x28] sm:$0xff]  ;;  %v1782_v1 = vld [vmem:[%s1732_s21 + $0x78] sm:$0xff]  ;;  %v1805_v11 = vld [vmem:[%s1732_s21 + $0x40] sm:$0xff] }
  0x1d   : > { %v383_v55 = vmul.f32 %v1752_v48, %v1743_v45  ;;  %v418_v63 = vmul.f32 %v1767_v56, %v1754_v49  ;;  %v419_v0 = vmul.f32 %v1770_v57, %v1754_v49  ;;  %v1785_v2 = vld [vmem:[%s1732_s21 + $0x88] sm:$0xff]  ;;  %v455_v3 = vmul.f32 %v1772_v58, %v1746_v46  ;;  %v1798_v8 = vld [vmem:[%s1732_s21 + $0x98] sm:$0xff] }
  0x1e   : > { %v398_v61 = vadd.f32 %v382_v54, %v362_v52  ;;  %v475_v4 = vmul.f32 %v1752_v48, %v1774_v59  ;;  %2553 = vst [vmem:[#allocation2_spill] sm:$0xff] %v1798_v8  ;;  %v1815_v14 = vld [vmem:[%s1732_s21 + $0x58] sm:$0xff]  ;;  %v454_v20 = vmul.f32 %v1772_v58, %v1739_v43  ;;  %v1866_v39 = vmul.f32 %v1767_v56, %v1791_v5 }
  0x1f   : > { %v399_v62 = vadd.f32 %v383_v55, %v363_v53  ;;  %2556 = vst [vmem:[#allocation5_spill] sm:$0xff] %v1815_v14  ;;  %v483_v52 = vmul.f32 %v1815_v14, %v1774_v59 }
  0x20   : > { %770 = vperm.xlu1 %1495, %v712_v9   ;;  %730 = vperm.xlu0 %1494, %v704_v10   ;;  %v1793_v6 = vadd.f32 %v418_v63, %v398_v61  ;;  %v377_v9 = vmul.f32 %v1741_v44, %v1782_v1  ;;  %v397_v10 = vmul.f32 %v1785_v2, %v1743_v45  ;;  %v1891_v63 = vld [vmem:[%s2522_s3 + $0x8] ss:$0 sm:$0xff] }
  0x21   : > { %v1795_v7 = vadd.f32 %v419_v0, %v399_v62  ;;  %v491_v17 = vadd.f32 %v475_v4, %v455_v3 }
  0x24   : > { %775 = vperm.xlu1 %1495, %v713_v12   ;;  %735 = vperm.xlu0 %1494, %v705_v13   ;;  %v1809_v12 = vld [vmem:[%s1732_s21 + $0x48] sm:$0xff]  ;;  %v1812_v13 = vld [vmem:[%s1732_s21 + $0x50] sm:$0xff] }
  0x25   : > { %2554 = vst [vmem:[#allocation3_spill] sm:$0xff] %v1809_v12  ;;  %2555 = vst [vmem:[#allocation4_spill] sm:$0xff] %v1812_v13  ;;  %v463_v51 = vmul.f32 %v1772_v58, %v1809_v12  ;;  %v389_v54 = vmul.f32 %v1743_v45, %v1809_v12 }
  0x28   : > { %898 = vperm.xlu1 %1495, %v840_v15   ;;  %858 = vperm.xlu0 %1494, %v832_v16   ;;  %v544_v15 = vsub.s32 2, %v1724_v38  ;;  %v564_v16 = vsub.s32 5, %v1724_v38 }
  0x2c   : > { %903 = vperm.xlu1 %1495, %v841_v18   ;;  %863 = vperm.xlu0 %1494, %v833_v19   ;;  %v511_v18 = vmul.f32 %v1770_v57, %v1791_v5  ;;  %v433_v19 = vmul.f32 %v1798_v8, %v1754_v49 }
  0x30   : > { %780 = vperm.xlu1 %1495, %v714_v21   ;;  %740 = vperm.xlu0 %1494, %v706_v22   ;;  %v2528_v21 = vrot.slane %v1793_v6, 7  ;;  %v2527_v22 = vrot.slane %v1795_v7, 7 }
  0x32   : > { %v1858_v35 = vsel %vm652_vm0, %v2528_v21, %v2527_v22 }
  0x34   : > { %785 = vperm.xlu1 %1495, %v715_v23   ;;  %745 = vperm.xlu0 %1494, %v707_v24   ;;  %v413_v23 = vadd.f32 %v397_v10, %v377_v9  ;;  %v474_v24 = vmul.f32 %v1749_v47, %v1774_v59 }
  0x38   : > { %908 = vperm.xlu1 %1495, %v842_v25   ;;  %868 = vperm.xlu0 %1494, %v834_v26   ;;  %v370_v25 = vmul.f32 %v1741_v44, %v1805_v11  ;;  %v371_v26 = vmul.f32 %v1741_v44, %v1809_v12 }
  0x3c   : > { %913 = vperm.xlu1 %1495, %v843_v27   ;;  %873 = vperm.xlu0 %1494, %v835_v28   ;;  %v390_v27 = vmul.f32 %v1812_v13, %v1743_v45  ;;  %v391_v28 = vmul.f32 %v1815_v14, %v1743_v45 }
  0x3e   : > { %v406_v40 = vadd.f32 %v390_v27, %v370_v25  ;;  %v407_v42 = vadd.f32 %v391_v28, %v371_v26  ;;  %v602_v27 = vmul.f32 %v1891_v63, %v1767_v56 }
  0x40   : > { %790 = vperm.xlu1 %1495, %v716_v29   ;;  %750 = vperm.xlu0 %1494, %v708_v30   ;;  %v1838_v29 = vld [vmem:[%s1732_s21 + $0x60] sm:$0xff]  ;;  %v1841_v30 = vld [vmem:[%s1732_s21 + $0x68] sm:$0xff] }
  0x41   : > { %v427_v50 = vmul.f32 %v1841_v30, %v1754_v49  ;;  %v610_v25 = vmul.f32 %v1891_v63, %v1838_v29  ;;  %v611_v26 = vmul.f32 %v1891_v63, %v1841_v30  ;;  %v519_v22 = vmul.f32 %v1841_v30, %v1791_v5 }
  0x44   : > { %795 = vperm.xlu1 %1495, %v717_v31   ;;  %755 = vperm.xlu0 %1494, %v709_v32   ;;  %v1843_v31 = vadd.f32 %v511_v18, %v491_v17  ;;  %v1846_v32 = vld [vmem:[%s1732_s21 + $0x38] sm:$0xff] }
  0x45   : > { %v369_v53 = vmul.f32 %v1741_v44, %v1846_v32 }
  0x46   : > { %2557 = vst [vmem:[#allocation6_spill] sm:$0xff] %v1843_v31 }
  0x47   : > { %v405_v18 = vadd.f32 %v389_v54, %v369_v53 }
  0x48   : > { %918 = vperm.xlu1 %1495, %v844_v33   ;;  %878 = vperm.xlu0 %1494, %v836_v34   ;;  %v1848_v33 = vrot.slane %v356_v41, %v544_v15  ;;  %v1850_v34 = vrot.slane %v356_v41, %v564_v16  ;;  %v426_v41 = vmul.f32 %v1838_v29, %v1754_v49 }
  0x4a   : > { %2558 = vst [vmem:[#allocation7_spill] sm:$0xff] %v1848_v33  ;;  %2559 = vst [vmem:[#allocation8_spill] sm:$0xff] %v1850_v34  ;;  %v554_v55 = vmul.f32 %v1848_v33, %v1805_v11  ;;  %v555_v60 = vmul.f32 %v1848_v33, %v1809_v12  ;;  %v574_v61 = vmul.f32 %v1812_v13, %v1850_v34 }
  0x4b   : > { %v546_v62 = vmul.f32 %v1848_v33, %v1739_v43  ;;  %v575_v0 = vmul.f32 %v1815_v14, %v1850_v34  ;;  %v547_v3 = vmul.f32 %v1848_v33, %v1746_v46  ;;  %v566_v4 = vmul.f32 %v1749_v47, %v1850_v34 }
  0x4c   : > { %923 = vperm.xlu1 %1495, %v845_v36   ;;  %883 = vperm.xlu0 %1494, %v837_v37   ;;  %v1860_v36 = vadd.f32 %v433_v19, %v413_v23  ;;  %v1862_v37 = vadd.f32 %v474_v24, %v454_v20  ;;  %v567_v9 = vmul.f32 %v1752_v48, %v1850_v34  ;;  %v1916_v20 = vld [vmem:[%s1732_s21 + $0x70] sm:$0xff] }
  0x4d   : > { %v556_v43 = vmul.f32 %v1812_v13, %v1848_v33  ;;  %v576_v10 = vmul.f32 %v1838_v29, %v1850_v34  ;;  %v548_v15 = vmul.f32 %v1749_v47, %v1848_v33  ;;  %v568_v16 = vmul.f32 %v1767_v56, %v1850_v34  ;;  %v1919_v23 = vld [vmem:[%s1732_s21 + $0x30] sm:$0xff] }
  0x4e   : > { %2560 = vst [vmem:[#allocation9_spill] sm:$0xff] %v1860_v36  ;;  %v1909_v17 = vadd.f32 %v426_v41, %v406_v40  ;;  %v1911_v46 = vadd.f32 %v427_v50, %v407_v42  ;;  %v425_v19 = vmul.f32 %v1815_v14, %v1754_v49  ;;  %v590_v24 = vadd.f32 %v574_v61, %v554_v55 }
  0x4f   : > { %v591_v28 = vadd.f32 %v575_v0, %v555_v60  ;;  %v582_v40 = vadd.f32 %v566_v4, %v546_v62  ;;  %v583_v42 = vadd.f32 %v567_v9, %v547_v3  ;;  %v603_v41 = vmul.f32 %v1891_v63, %v1770_v57 }
  0x50   : > { %v592_v50 = vadd.f32 %v576_v10, %v556_v43  ;;  %v612_v53 = vmul.f32 %v1891_v63, %v1916_v20  ;;  %v584_v54 = vadd.f32 %v568_v16, %v548_v15  ;;  %v604_v55 = vmul.f32 %v1891_v63, %v1919_v23 }
  0x51   : > { %v372_v60 = vmul.f32 %v1812_v13, %v1741_v44  ;;  %v392_v62 = vmul.f32 %v1838_v29, %v1743_v45  ;;  %v499_v0 = vadd.f32 %v483_v52, %v463_v51  ;;  %v642_v3 = vrot.slane %v1909_v17, 7 }
  0x52   : > { %v462_v4 = vmul.f32 %v1772_v58, %v1805_v11  ;;  %v482_v9 = vmul.f32 %v1812_v13, %v1774_v59  ;;  %v1946_v43 = vadd.f32 %v425_v19, %v405_v18  ;;  %v1948_v10 = vadd.f32 %v610_v25, %v590_v24 }
  0x53   : > { %v627_v15 = vadd.f32 %v611_v26, %v591_v28  ;;  %v1950_v16 = vadd.f32 %v602_v27, %v582_v40  ;;  %v2534_v61 = vrot.slane %v1911_v46, 7  ;;  %v619_v21 = vadd.f32 %v603_v41, %v583_v42 }
  0x54   : > { %2561 = vst [vmem:[#allocation10_spill] sm:$0xff] %v1946_v43  ;;  %2562 = vst [vmem:[#allocation11_spill] sm:$0xff] %v1948_v10  ;;  %v1953_v8 = vadd.f32 %v612_v53, %v592_v50  ;;  %v1955_v51 = vadd.f32 %v604_v55, %v584_v54  ;;  %v408_v52 = vadd.f32 %v392_v62, %v372_v60  ;;  %v2533_v28 = vrot.slane %v1946_v43, 7 }
  0x55   : > { %2563 = vst [vmem:[#allocation12_spill] sm:$0xff] %v1950_v16  ;;  %v428_v17 = vmul.f32 %v1916_v20, %v1754_v49  ;;  %v464_v18 = vmul.f32 %v1812_v13, %v1772_v58  ;;  %v484_v19 = vmul.f32 %v1838_v29, %v1774_v59  ;;  %v498_v24 = vadd.f32 %v482_v9, %v462_v4 }
  0x56   : > { %v518_v25 = vmul.f32 %v1838_v29, %v1791_v5  ;;  %v364_v26 = vmul.f32 %v1749_v47, %v1741_v44  ;;  %v384_v27 = vmul.f32 %v1767_v56, %v1743_v45  ;;  %v2531_v40 = vrot.slane %v1948_v10, 1 }
  0x57   : > { %v678_v42 = vrot.slane %v627_v15, 1  ;;  %v2532_v41 = vrot.slane %v1950_v16, 1  ;;  %v670_v50 = vrot.slane %v619_v21, 1  ;;  %v520_v55 = vmul.f32 %v1916_v20, %v1791_v5 }
  0x58   : > { %v1976_v60 = vadd.f32 %v428_v17, %v408_v52  ;;  %v500_v62 = vadd.f32 %v484_v19, %v464_v18  ;;  %v456_v4 = vmul.f32 %v1749_v47, %v1772_v58  ;;  %v476_v9 = vmul.f32 %v1767_v56, %v1774_v59 }
  0x59   : > { %v1984_v15 = vadd.f32 %v1866_v39, %v1862_v37  ;;  %v2564_v21 = vrot.slane %v1793_v6, 7  ;;  %v2565_v54 = vrot.slane %v1860_v36, 7  ;;  %v400_v52 = vadd.f32 %v384_v27, %v364_v26 }
  0x5a   : > { %v420_v17 = vmul.f32 %v1919_v23, %v1754_v49  ;;  %v1996_v47 = vadd.f32 %v519_v22, %v499_v0  ;;  %v2002_v37 = vsel %vm652_vm0, %v642_v3, %v2534_v61  ;;  %v2004_v39 = vadd.f32 %v518_v25, %v498_v24  ;;  %v2070_v61 = vld [vmem:[%s1732_s21 + $0x80] sm:$0xff] }
  0x5b   : > { %v1992_v53 = vsel %vm652_vm0, %v2565_v54, %v2564_v21  ;;  %v2010_v6 = vsel %vm652_vm0, %v2533_v28, %v642_v3  ;;  %v2016_v22 = vsel %vm685_vm1, %v2531_v40, %v678_v42  ;;  %v2022_v0 = vsel %vm685_vm1, %v2532_v41, %v670_v50 }
  0x5c   : > { %2566 = vst [vmem:[#allocation13_spill] sm:$0xff] %v1996_v47  ;;  %v2567_v18 = vrot.slane %v1953_v8, 1  ;;  %v2569_v3 = vrot.slane %v1955_v51, 1  ;;  %v2036_v25 = vadd.f32 %v520_v55, %v500_v62  ;;  %v492_v27 = vadd.f32 %v476_v9, %v456_v4 }
  0x5d   : > { %v512_v54 = vmul.f32 %v1919_v23, %v1791_v5  ;;  %v2041_v21 = vadd.f32 %v420_v17, %v400_v52  ;;  %v365_v55 = vmul.f32 %v1752_v48, %v1741_v44  ;;  %v385_v62 = vmul.f32 %v1770_v57, %v1743_v45 }
  0x5e   : > { %v2028_v19 = vsel %vm685_vm1, %v678_v42, %v2567_v18  ;;  %v2034_v24 = vsel %vm685_vm1, %v670_v50, %v2569_v3  ;;  %2571 = vst [vmem:[#allocation16_spill] sm:$0xff] %v2036_v25  ;;  %v373_v42 = vmul.f32 %v1815_v14, %v1741_v44  ;;  %v393_v18 = vmul.f32 %v1841_v30, %v1743_v45 }
  0x5f   : > { %2568 = vst [vmem:[#allocation14_spill] sm:$0xff] %v2028_v19  ;;  %2570 = vst [vmem:[#allocation15_spill] sm:$0xff] %v2034_v24  ;;  %v429_v50 = vmul.f32 %v1754_v49, %v1782_v1  ;;  %v557_v4 = vmul.f32 %v1815_v14, %v1848_v33  ;;  %v577_v9 = vmul.f32 %v1841_v30, %v1850_v34  ;;  %v636_v47 = vrot.slane %v2041_v21, 7 }
  0x60   : > { %v549_v52 = vmul.f32 %v1752_v48, %v1848_v33  ;;  %v569_v17 = vmul.f32 %v1770_v57, %v1850_v34  ;;  %v558_v3 = vmul.f32 %v1838_v29, %v1848_v33  ;;  %v578_v40 = vmul.f32 %v1916_v20, %v1850_v34 }
  0x61   : > { %v465_v41 = vmul.f32 %v1815_v14, %v1772_v58  ;;  %v485_v28 = vmul.f32 %v1841_v30, %v1774_v59  ;;  %v550_v26 = vmul.f32 %v1767_v56, %v1848_v33  ;;  %v570_v10 = vmul.f32 %v1919_v23, %v1850_v34 }
  0x62   : > { %v409_v16 = vadd.f32 %v393_v18, %v373_v42  ;;  %v521_v43 = vmul.f32 %v1791_v5, %v1782_v1  ;;  %v374_v36 = vmul.f32 %v1838_v29, %v1741_v44  ;;  %v394_v14 = vmul.f32 %v1916_v20, %v1743_v45 }
  0x63   : > { %v401_v13 = vadd.f32 %v385_v62, %v365_v55  ;;  %v421_v25 = vmul.f32 %v1754_v49, %v1846_v32  ;;  %v593_v24 = vadd.f32 %v577_v9, %v557_v4  ;;  %v613_v33 = vmul.f32 %v1891_v63, %v1782_v1 }
  0x64   : > { %v585_v19 = vadd.f32 %v569_v17, %v549_v52  ;;  %v605_v42 = vmul.f32 %v1891_v63, %v1846_v32  ;;  %v594_v18 = vadd.f32 %v578_v40, %v558_v3  ;;  %v614_v34 = vmul.f32 %v1891_v63, %v2070_v61 }
  0x65   : > { %v501_v31 = vadd.f32 %v485_v28, %v465_v41  ;;  %v586_v12 = vadd.f32 %v570_v10, %v550_v26  ;;  %v606_v55 = vmul.f32 %v1891_v63, %v1805_v11  ;;  %v2572_v62 = vrot.slane %v1976_v60, 7 }
  0x66   : > { %v2573_v4 = vrot.slane %v1911_v46, 7  ;;  %v445_v52 = vadd.f32 %v429_v50, %v409_v16  ;;  %v410_v40 = vadd.f32 %v394_v14, %v374_v36  ;;  %v430_v17 = vmul.f32 %v2070_v61, %v1754_v49 }
  0x67   : > { %v2103_v3 = vadd.f32 %v421_v25, %v401_v13  ;;  %v457_v10 = vmul.f32 %v1752_v48, %v1772_v58  ;;  %v477_v28 = vmul.f32 %v1770_v57, %v1774_v59  ;;  %v629_v41 = vadd.f32 %v613_v33, %v593_v24 }
  0x68   : > { %v2099_v9 = vsel %vm652_vm0, %v2573_v4, %v2572_v62  ;;  %v621_v26 = vadd.f32 %v605_v42, %v585_v19  ;;  %v2109_v46 = vadd.f32 %v614_v34, %v594_v18  ;;  %v466_v21 = vmul.f32 %v1838_v29, %v1772_v58 }
  0x69   : > { %v486_v14 = vmul.f32 %v1916_v20, %v1774_v59  ;;  %v2115_v36 = vadd.f32 %v512_v54, %v492_v27  ;;  %v2574_v13 = vrot.slane %v1795_v7, 7  ;;  %v2123_v16 = vadd.f32 %v521_v43, %v501_v31 }
  0x6a   : > { %v2125_v33 = vadd.f32 %v606_v55, %v586_v12  ;;  %v645_v34 = vrot.slane %v445_v52, 7  ;;  %v2127_v19 = vadd.f32 %v430_v17, %v410_v40  ;;  %v366_v29 = vmul.f32 %v1767_v56, %v1741_v44 }
  0x6b   : > { %v2121_v48 = vsel %vm652_vm0, %v2574_v13, %v636_v47  ;;  %v386_v24 = vmul.f32 %v1919_v23, %v1743_v45  ;;  %v493_v7 = vadd.f32 %v477_v28, %v457_v10  ;;  %v513_v54 = vmul.f32 %v1791_v5, %v1846_v32 }
  0x6c   : > { %v2551_v31 = vrot.slane %v2103_v3, 7  ;;  %v680_v43 = vrot.slane %v629_v41, 1  ;;  %v672_v12 = vrot.slane %v621_v26, 1  ;;  %v2550_v50 = vrot.slane %v2109_v46, 1 }
  0x6d   : > { %v502_v42 = vadd.f32 %v486_v14, %v466_v21  ;;  %v522_v18 = vmul.f32 %v2070_v61, %v1791_v5  ;;  %v2549_v55 = vrot.slane %v2125_v33, 1  ;;  %v422_v62 = vmul.f32 %v1754_v49, %v1805_v11 }
  0x6e   : > { %v458_v4 = vmul.f32 %v1767_v56, %v1772_v58  ;;  %v478_v52 = vmul.f32 %v1919_v23, %v1774_v59  ;;  %v402_v17 = vadd.f32 %v386_v24, %v366_v29  ;;  %v375_v10 = vmul.f32 %v1841_v30, %v1741_v44 }
  0x6f   : > { %v395_v28 = vmul.f32 %v1743_v45, %v1782_v1  ;;  %v2575_v21 = vrot.slane %v1976_v60, 7  ;;  %v2157_v56 = vadd.f32 %v513_v54, %v493_v7  ;;  %v2163_v13 = vsel %vm652_vm0, %v636_v47, %v2551_v31  ;;  %v2585_v31 = vld [vmem:[#allocation14_spill] sm:$0xff] }
  0x70   : > { %v2576_v29 = vrot.slane %v1953_v8, 1  ;;  %v2183_v47 = vsel %vm685_vm1, %v680_v43, %v2550_v50  ;;  %v2189_v8 = vsel %vm685_vm1, %v672_v12, %v2549_v55 }
  0x71   : > { %v2155_v14 = vsel %vm652_vm0, %v2575_v21, %v645_v34  ;;  %v2577_v21 = vrot.slane %v1955_v51, 1  ;;  %v514_v51 = vmul.f32 %v1791_v5, %v1805_v11 }
  0x72   : > { %v2169_v24 = vsel %vm685_vm1, %v2576_v29, %v680_v43  ;;  %v2201_v43 = vadd.f32 %v422_v62, %v402_v17  ;;  %v431_v29 = vmul.f32 %v1785_v2, %v1754_v49 }
  0x73   : > { %v2177_v7 = vsel %vm685_vm1, %v2577_v21, %v672_v12  ;;  %v387_v21 = vmul.f32 %v1743_v45, %v1846_v32 }
  0x8b   : > { %v726_v25 = vpop.permute.xlu1 %725  ;;  %v721_v27 = vpop.permute.xlu0 %720 }
  0x8c   : > { %v798_v60 = vmul.f32 %v721_v27, %v1992_v53  ;;  %v2191_v53 = vadd.f32 %v522_v18, %v502_v42  ;;  %v2579_v27 = vrot.slane %v2127_v19, 7  ;;  %v799_v12 = vmul.f32 %v726_v25, %v1858_v35  ;;  %v2218_v35 = vld [vmem:[%s2523_s4] ss:$0 sm:$0xff] }
  0x8d   : > { %v467_v25 = vmul.f32 %v1841_v30, %v1772_v58 }
  0x8e   : > { %2578 = vst [vmem:[#allocation17_spill] sm:$0xff] %v2191_v53  ;;  %v2199_v54 = vsel %vm652_vm0, %v645_v34, %v2579_v27  ;;  %v814_v34 = vadd.f32 %v798_v60, %v1984_v15  ;;  %v487_v15 = vmul.f32 %v1774_v59, %v1782_v1  ;;  %v2583_v60 = vld [vmem:[#allocation6_spill] sm:$0xff]  ;;  %v2586_v53 = vld [vmem:[#allocation15_spill] sm:$0xff] }
  0x8f   : > { %v766_v41 = vpop.permute.xlu1 %765  ;;  %v761_v26 = vpop.permute.xlu0 %760  ;;  %2580 = vst [vmem:[#allocation18_spill] sm:$0xff] %v2199_v54  ;;  %v815_v27 = vadd.f32 %v799_v12, %v2583_v60  ;;  %v2587_v12 = vld [vmem:[#allocation7_spill] sm:$0xff]  ;;  %v2588_v60 = vld [vmem:[#allocation8_spill] sm:$0xff] }
  0x90   : > { %v806_v40 = vmul.f32 %v761_v26, %v2010_v6  ;;  %v494_v6 = vadd.f32 %v478_v52, %v458_v4  ;;  %v411_v26 = vadd.f32 %v395_v28, %v375_v10  ;;  %v807_v42 = vmul.f32 %v766_v41, %v2002_v37  ;;  %v2582_v28 = vld [vmem:[#allocation3_spill] sm:$0xff] }
  0x91   : > { %v367_v52 = vmul.f32 %v1770_v57, %v1741_v44  ;;  %v423_v41 = vmul.f32 %v1754_v49, %v2582_v28 }
  0x92   : > { %v822_v62 = vadd.f32 %v806_v40, %v2004_v39  ;;  %v2220_v37 = vadd.f32 %v514_v51, %v494_v6  ;;  %v523_v39 = vmul.f32 %v1785_v2, %v1791_v5  ;;  %v2584_v6 = vld [vmem:[#allocation13_spill] sm:$0xff]  ;;  %v2233_v55 = vadd.f32 %v431_v29, %v411_v26 }
  0x93   : > { %v889_v18 = vpop.permute.xlu1 %888  ;;  %v849_v4 = vpop.permute.xlu0 %848  ;;  %v823_v51 = vadd.f32 %v807_v42, %v2584_v6  ;;  %v403_v50 = vadd.f32 %v387_v21, %v367_v52  ;;  %v559_v42 = vmul.f32 %v1841_v30, %v2587_v12  ;;  %v579_v26 = vmul.f32 %v2588_v60, %v1782_v1 }
  0x94   : > { %v934_v17 = vmul.f32 %v889_v18, %v2016_v22  ;;  %v926_v10 = vmul.f32 %v849_v4, %v2022_v0  ;;  %2581 = vst [vmem:[#allocation19_spill] sm:$0xff] %v2220_v37  ;;  %v2552_v0 = vrot.slane %v2201_v43, 7  ;;  %v479_v30 = vmul.f32 %v1774_v59, %v1846_v32 }
  0x96   : > { %v950_v22 = vadd.f32 %v934_v17, %v822_v62  ;;  %v942_v40 = vadd.f32 %v926_v10, %v814_v34  ;;  %v503_v17 = vadd.f32 %v487_v15, %v467_v25  ;;  %v459_v10 = vmul.f32 %v1770_v57, %v1772_v58 }
  0x97   : > { %v894_v18 = vpop.permute.xlu1 %893  ;;  %v854_v4 = vpop.permute.xlu0 %853  ;;  %v647_v15 = vrot.slane %v2233_v55, 7 }
  0x98   : > { %v935_v37 = vmul.f32 %v894_v18, %v2585_v31  ;;  %v927_v54 = vmul.f32 %v854_v4, %v2586_v53  ;;  %v965_v34 = vadd.f32 %v2218_v35, %v942_v40  ;;  %v973_v62 = vadd.f32 %v2218_v35, %v950_v22 }
  0x99   : > { %v2589_v22 = vrot.slane %v2103_v3, 7  ;;  %v551_v3 = vmul.f32 %v1770_v57, %v2587_v12  ;;  %v595_v4 = vadd.f32 %v579_v26, %v559_v42  ;;  %v495_v42 = vadd.f32 %v479_v30, %v459_v10 }
  0x9a   : > { %v951_v29 = vadd.f32 %v935_v37, %v823_v51  ;;  %v943_v52 = vadd.f32 %v927_v54, %v815_v27  ;;  %v981_v21 = vmax.f32 %v965_v34, 0.0  ;;  %v989_v31 = vmax.f32 %v973_v62, 0.0 }
  0x9b   : > { %v771_v6 = vpop.permute.xlu1 %770  ;;  %v731_v53 = vpop.permute.xlu0 %730  ;;  %v2251_v25 = vsel %vm652_vm0, %v2589_v22, %v2552_v0  ;;  %v615_v54 = vmul.f32 %v1891_v63, %v1785_v2  ;;  %v2260_v27 = vadd.f32 %v423_v41, %v403_v50  ;;  %v571_v34 = vmul.f32 %v2588_v60, %v1846_v32 }
  0x9c   : > { %v974_v37 = vadd.f32 %v2218_v35, %v951_v29  ;;  %v966_v40 = vadd.f32 %v2218_v35, %v943_v52  ;;  %v997_v51 = vmin.f32 %v981_v21, 6.0  ;;  %v1005_v18 = vmin.f32 %v989_v31, 6.0  ;;  %v2277_v52 = vld [vmem:[%s1732_s21 + $0x90] sm:$0xff] }
  0x9d   : > { %v560_v0 = vmul.f32 %v1916_v20, %v2587_v12  ;;  %v580_v29 = vmul.f32 %v2070_v61, %v2588_v60  ;;  %v2272_v41 = vadd.f32 %v523_v39, %v503_v17  ;;  %v515_v26 = vmul.f32 %v1791_v5, %v2582_v28 }
  0x9e   : > { %v990_v62 = vmax.f32 %v974_v37, 0.0  ;;  %v982_v22 = vmax.f32 %v966_v40, 0.0  ;;  %1420 = vmatprep.mubr.msk.f32.mxu0 %vm1024_vm2, %v997_v51  ;;  %1432 = vmatprep.mubr.msk.f32.mxu1 %vm1024_vm2, %v1005_v18  ;;  %v808_v37 = vmul.f32 %v771_v6, %v2099_v9  ;;  %v800_v40 = vmul.f32 %v731_v53, %v2121_v48 }
  0x9f   : > { %v776_v57 = vpop.permute.xlu1 %775  ;;  %v736_v50 = vpop.permute.xlu0 %735  ;;  %v2590_v51 = vrot.slane %v2127_v19, 7  ;;  %v639_v17 = vrot.slane %v2260_v27, 7  ;;  %v587_v10 = vadd.f32 %v571_v34, %v551_v3  ;;  %v607_v30 = vmul.f32 %v1891_v63, %v2582_v28 }
  0xa0   : > { %v1006_v21 = vmin.f32 %v990_v62, 6.0  ;;  %v998_v31 = vmin.f32 %v982_v22, 6.0  ;;  %v2294_v9 = vadd.f32 %v615_v54, %v595_v4  ;;  %v596_v48 = vadd.f32 %v580_v29, %v560_v0  ;;  %v2591_v22 = vld [vmem:[#allocation16_spill] sm:$0xff] }
  0xa1   : > { %v2287_v39 = vsel %vm652_vm0, %v2590_v51, %v647_v15  ;;  %v616_v19 = vmul.f32 %v1891_v63, %v2277_v52  ;;  %v809_v6 = vmul.f32 %v776_v57, %v2155_v14  ;;  %v801_v53 = vmul.f32 %v736_v50, %v2163_v13  ;;  %v2593_v50 = vld [vmem:[#allocation4_spill] sm:$0xff] }
  0xa2   : > { %1421 = vmatmul.mubr.msk.f32.vlgmr.msra.gmra.mxu0 %vm1024_vm2, %v998_v31  ;;  %1433 = vmatmul.mubr.msk.f32.vlgmr.msra.gmra.mxu1 %vm1024_vm2, %v1006_v21  ;;  %v552_v3 = vmul.f32 %v1919_v23, %v2587_v12  ;;  %v572_v34 = vmul.f32 %v2588_v60, %v1805_v11  ;;  %v824_v21 = vadd.f32 %v808_v37, %v2591_v22  ;;  %v2592_v14 = vrot.slane %v2201_v43, 7 }
  0xa3   : > { %v899_v18 = vpop.permute.xlu1 %898  ;;  %v859_v62 = vpop.permute.xlu0 %858  ;;  %v816_v54 = vadd.f32 %v800_v40, %v2115_v36  ;;  %v2308_v29 = vadd.f32 %v515_v26, %v495_v42  ;;  %v2318_v57 = vadd.f32 %v607_v30, %v587_v10  ;;  %v608_v31 = vmul.f32 %v1891_v63, %v2593_v50 }
  0xa4   : > { %v936_v0 = vmul.f32 %v899_v18, %v2169_v24  ;;  %v928_v4 = vmul.f32 %v859_v62, %v2177_v7  ;;  %v2316_v13 = vsel %vm652_vm0, %v2592_v14, %v639_v17  ;;  %v682_v24 = vrot.slane %v2294_v9, 1 }
  0xa5   : > { %v376_v7 = vmul.f32 %v1916_v20, %v1741_v44  ;;  %v825_v42 = vadd.f32 %v809_v6, %v2123_v16  ;;  %v817_v43 = vadd.f32 %v801_v53, %v2157_v56  ;;  %v2327_v51 = vadd.f32 %v616_v19, %v596_v48 }
  0xa6   : > { %v952_v36 = vadd.f32 %v936_v0, %v824_v21  ;;  %v944_v37 = vadd.f32 %v928_v4, %v816_v54  ;;  %v588_v10 = vadd.f32 %v572_v34, %v552_v3  ;;  %v674_v22 = vrot.slane %v2318_v57, 1 }
  0xa7   : > { %v904_v26 = vpop.permute.xlu1 %903  ;;  %v864_v40 = vpop.permute.xlu0 %863  ;;  %v396_v16 = vmul.f32 %v2070_v61, %v1743_v45  ;;  %v468_v56 = vmul.f32 %v1916_v20, %v1772_v58  ;;  %v488_v48 = vmul.f32 %v2070_v61, %v1774_v59  ;;  %v368_v54 = vmul.f32 %v1919_v23, %v1741_v44 }
  0xa8   : > { %v975_v30 = vadd.f32 %v2218_v35, %v952_v36  ;;  %v967_v18 = vadd.f32 %v2218_v35, %v944_v37  ;;  %v937_v62 = vmul.f32 %v904_v26, %v2183_v47  ;;  %v929_v9 = vmul.f32 %v864_v40, %v2189_v8 }
  0xa9   : > { %v683_v47 = vrot.slane %v2327_v51, 1  ;;  %v2341_v8 = vadd.f32 %v608_v31, %v588_v10  ;;  %v388_v0 = vmul.f32 %v1743_v45, %v1805_v11  ;;  %v2594_v57 = vrot.slane %v2109_v46, 1 }
  0xaa   : > { %v991_v19 = vmax.f32 %v975_v30, 0.0  ;;  %v983_v6 = vmax.f32 %v967_v18, 0.0  ;;  %v953_v53 = vadd.f32 %v937_v62, %v825_v42  ;;  %v945_v3 = vadd.f32 %v929_v9, %v817_v43 }
  0xab   : > { %v781_v34 = vpop.permute.xlu1 %780  ;;  %v741_v21 = vpop.permute.xlu0 %740  ;;  %v688_v36 = vsel %vm685_vm1, %v2594_v57, %v682_v24  ;;  %v412_v37 = vadd.f32 %v396_v16, %v376_v7  ;;  %v432_v31 = vmul.f32 %v2277_v52, %v1754_v49  ;;  %v524_v44 = vmul.f32 %v2277_v52, %v1791_v5 }
  0xac   : > { %v1007_v20 = vmin.f32 %v991_v19, 6.0  ;;  %v999_v4 = vmin.f32 %v983_v6, 6.0  ;;  %v976_v61 = vadd.f32 %v2218_v35, %v953_v53  ;;  %v968_v14 = vadd.f32 %v2218_v35, %v945_v3 }
  0xad   : > { %v2595_v43 = vrot.slane %v2125_v33, 1  ;;  %v504_v26 = vadd.f32 %v488_v48, %v468_v56  ;;  %v687_v10 = vsel %vm685_vm1, %v682_v24, %v683_v47  ;;  %v675_v52 = vrot.slane %v2341_v8, 1  ;;  %v2596_v33 = vld [vmem:[#allocation18_spill] sm:$0xff] }
  0xae   : > { %v992_v42 = vmax.f32 %v976_v61, 0.0  ;;  %v984_v45 = vmax.f32 %v968_v14, 0.0  ;;  %1423 = vmatprep.mubr.msk.f32.mxu0 %vm1024_vm2, %v999_v4  ;;  %1435 = vmatprep.mubr.msk.f32.mxu1 %vm1024_vm2, %v1007_v20  ;;  %v404_v30 = vadd.f32 %v388_v0, %v368_v54  ;;  %v424_v18 = vmul.f32 %v2593_v50, %v1754_v49  ;;  %v2597_v0 = vld [vmem:[#allocation17_spill] sm:$0xff]  ;;  %v2598_v4 = vld [vmem:[#allocation19_spill] sm:$0xff] }
  0xaf   : > { %v696_v46 = vsel %vm685_vm1, %v2595_v43, %v674_v22  ;;  %v786_v40 = vpop.permute.xlu1 %785  ;;  %v746_v7 = vpop.permute.xlu0 %745  ;;  %v810_v16 = vmul.f32 %v781_v34, %v2596_v33  ;;  %v802_v19 = vmul.f32 %v741_v21, %v2251_v25  ;;  %v561_v56 = vmul.f32 %v2587_v12, %v1782_v1 }
  0xb0   : > { %v1008_v62 = vmin.f32 %v992_v42, 6.0  ;;  %v1000_v9 = vmin.f32 %v984_v45, 6.0  ;;  %v581_v48 = vmul.f32 %v1785_v2, %v2588_v60  ;;  %v553_v24 = vmul.f32 %v2587_v12, %v1846_v32 }
  0xb1   : > { %v573_v6 = vmul.f32 %v2588_v60, %v2582_v28  ;;  %v448_v49 = vadd.f32 %v432_v31, %v412_v37  ;;  %v460_v25 = vmul.f32 %v1919_v23, %v1772_v58  ;;  %v480_v53 = vmul.f32 %v1774_v59, %v1805_v11  ;;  %v2599_v11 = vld [vmem:[#allocation2_spill] sm:$0xff] }
  0xb2   : > { %1424 = vmatmul.mubr.msk.f32.gmra.mxu0 %vm1024_vm2, %v1000_v9  ;;  %1436 = vmatmul.mubr.msk.f32.gmra.mxu1 %vm1024_vm2, %v1008_v62  ;;  %v811_v3 = vmul.f32 %v786_v40, %v2287_v39  ;;  %v803_v34 = vmul.f32 %v746_v7, %v2316_v13  ;;  %v695_v60 = vsel %vm685_vm1, %v674_v22, %v675_v52  ;;  %v2600_v13 = vld [vmem:[#allocation5_spill] sm:$0xff] }
  0xb3   : > { %v909_v21 = vpop.permute.xlu1 %908  ;;  %v869_v12 = vpop.permute.xlu0 %868  ;;  %v440_v54 = vadd.f32 %v424_v18, %v404_v30  ;;  %v826_v20 = vadd.f32 %v810_v16, %v2597_v0  ;;  %v818_v61 = vadd.f32 %v802_v19, %v2598_v4  ;;  %v597_v57 = vadd.f32 %v581_v48, %v561_v56  ;;  %v2603_v4 = vld [vmem:[#allocation10_spill] sm:$0xff] }
  0xb4   : > { %v938_v23 = vmul.f32 %v909_v21, %v688_v36  ;;  %v930_v14 = vmul.f32 %v869_v12, %v696_v46  ;;  %v617_v39 = vmul.f32 %v1891_v63, %v2599_v11  ;;  %v589_v37 = vadd.f32 %v573_v6, %v553_v24 }
  0xb5   : > { %v609_v31 = vmul.f32 %v1891_v63, %v2600_v13  ;;  %v540_v43 = vadd.f32 %v524_v44, %v504_v26  ;;  %v648_v40 = vrot.slane %v448_v49, 7  ;;  %v827_v22 = vadd.f32 %v811_v3, %v2272_v41 }
  0xb6   : > { %v954_v42 = vadd.f32 %v938_v23, %v826_v20  ;;  %v946_v45 = vadd.f32 %v930_v14, %v818_v61  ;;  %v819_v7 = vadd.f32 %v803_v34, %v2308_v29  ;;  %v516_v36 = vmul.f32 %v2593_v50, %v1791_v5 }
  0xb7   : > { %v914_v30 = vpop.permute.xlu1 %913  ;;  %v874_v18 = vpop.permute.xlu0 %873  ;;  %v469_v46 = vmul.f32 %v1772_v58, %v1782_v1  ;;  %v496_v44 = vadd.f32 %v480_v53, %v460_v25  ;;  %v640_v26 = vrot.slane %v440_v54, 7  ;;  %v633_v16 = vadd.f32 %v617_v39, %v597_v57 }
  0xb8   : > { %v977_v62 = vadd.f32 %v2218_v35, %v954_v42  ;;  %v969_v63 = vadd.f32 %v2218_v35, %v946_v45  ;;  %v939_v9 = vmul.f32 %v914_v30, %v687_v10  ;;  %v931_v33 = vmul.f32 %v874_v18, %v695_v60  ;;  %v2601_v60 = vld [vmem:[#allocation9_spill] sm:$0xff] }
  0xb9   : > { %v625_v41 = vadd.f32 %v609_v31, %v589_v37  ;;  %v489_v50 = vmul.f32 %v1785_v2, %v1774_v59  ;;  %v525_v1 = vmul.f32 %v2599_v11, %v1791_v5  ;;  %v461_v10 = vmul.f32 %v1772_v58, %v1846_v32 }
  0xba   : > { %v993_v19 = vmax.f32 %v977_v62, 0.0  ;;  %v985_v29 = vmax.f32 %v969_v63, 0.0  ;;  %v955_v56 = vadd.f32 %v939_v9, %v827_v22  ;;  %v947_v48 = vadd.f32 %v931_v33, %v819_v7 }
  0xbb   : > { %v791_v24 = vpop.permute.xlu1 %790  ;;  %v751_v6 = vpop.permute.xlu0 %750  ;;  %v481_v49 = vmul.f32 %v1774_v59, %v2582_v28  ;;  %v654_v2 = vsel %vm652_vm0, %v647_v15, %v648_v40  ;;  %v662_v21 = vsel %vm652_vm0, %v639_v17, %v640_v26  ;;  %v684_v58 = vrot.slane %v633_v16, 1 }
  0xbc   : > { %v1009_v25 = vmin.f32 %v993_v19, 6.0  ;;  %v1001_v53 = vmin.f32 %v985_v29, 6.0  ;;  %v978_v3 = vadd.f32 %v2218_v35, %v955_v56  ;;  %v970_v34 = vadd.f32 %v2218_v35, %v947_v48 }
  0xbd   : > { %v676_v32 = vrot.slane %v625_v41, 1  ;;  %v532_v28 = vadd.f32 %v516_v36, %v496_v44  ;;  %v2602_v54 = vrot.slane %v2601_v60, 7  ;;  %v505_v0 = vadd.f32 %v489_v50, %v469_v46 }
  0xbe   : > { %v994_v12 = vmax.f32 %v978_v3, 0.0  ;;  %v986_v59 = vmax.f32 %v970_v34, 0.0  ;;  %1426 = vmatprep.mubr.msk.f32.mxu0 %vm1024_vm2, %v1001_v53  ;;  %1438 = vmatprep.mubr.msk.f32.mxu1 %vm1024_vm2, %v1009_v25  ;;  %v497_v20 = vadd.f32 %v481_v49, %v461_v10  ;;  %v517_v17 = vmul.f32 %v2600_v13, %v1791_v5 }
  0xbf   : > { %v653_v55 = vsel %vm652_vm0, %v648_v40, %v2602_v54  ;;  %v796_v15 = vpop.permute.xlu1 %795  ;;  %v756_v27 = vpop.permute.xlu0 %755  ;;  %v2604_v61 = vrot.slane %v2603_v4, 7  ;;  %v812_v11 = vmul.f32 %v791_v24, %v654_v2  ;;  %v804_v39 = vmul.f32 %v751_v6, %v662_v21 }
  0xc0   : > { %v1010_v14 = vmin.f32 %v994_v12, 6.0  ;;  %v1002_v57 = vmin.f32 %v986_v59, 6.0  ;;  %v686_v37 = vsel %vm685_vm1, %v683_v47, %v684_v58  ;;  %v694_v31 = vsel %vm685_vm1, %v675_v52, %v676_v32  ;;  %v2605_v47 = vld [vmem:[#allocation12_spill] sm:$0xff]  ;;  %v2607_v52 = vld [vmem:[#allocation11_spill] sm:$0xff] }
  0xc1   : > { %v661_v23 = vsel %vm652_vm0, %v640_v26, %v2604_v61  ;;  %v541_v5 = vadd.f32 %v525_v1, %v505_v0  ;;  %v813_v13 = vmul.f32 %v796_v15, %v653_v55  ;;  %v533_v42 = vadd.f32 %v517_v17, %v497_v20 }
  0xc2   : > { %1427 = vmatmul.mubr.msk.f32.gmra.mxu0 %vm1024_vm2, %v1002_v57  ;;  %1439 = vmatmul.mubr.msk.f32.gmra.mxu1 %vm1024_vm2, %v1010_v14  ;;  %v805_v45 = vmul.f32 %v756_v27, %v661_v23  ;;  %v828_v7 = vadd.f32 %v812_v11, %v540_v43  ;;  %v820_v51 = vadd.f32 %v804_v39, %v532_v28  ;;  %v2606_v36 = vrot.slane %v2605_v47, 1 }
  0xc3   : > { %v919_v40 = vpop.permute.xlu1 %918  ;;  %v879_v22 = vpop.permute.xlu0 %878  ;;  %v2608_v46 = vrot.slane %v2607_v52, 1  ;;  %v829_v33 = vadd.f32 %v813_v13, %v541_v5 }
  0xc4   : > { %v940_v30 = vmul.f32 %v919_v40, %v686_v37  ;;  %v932_v18 = vmul.f32 %v879_v22, %v694_v31  ;;  %v701_v8 = vsel %vm685_vm1, %v684_v58, %v2606_v36  ;;  %v821_v44 = vadd.f32 %v805_v45, %v533_v42 }
  0xc5   : > { %v693_v62 = vsel %vm685_vm1, %v676_v32, %v2608_v46 }
  0xc6   : > { %v956_v63 = vadd.f32 %v940_v30, %v828_v7  ;;  %v948_v9 = vadd.f32 %v932_v18, %v820_v51 }
  0xc7   : > { %v924_v26 = vpop.permute.xlu1 %923  ;;  %v884_v16 = vpop.permute.xlu0 %883 }
  0xc8   : > { %v979_v43 = vadd.f32 %v2218_v35, %v956_v63  ;;  %v971_v41 = vadd.f32 %v2218_v35, %v948_v9  ;;  %v941_v19 = vmul.f32 %v924_v26, %v701_v8  ;;  %v933_v29 = vmul.f32 %v884_v16, %v693_v62 }
  0xca   : > { %v995_v56 = vmax.f32 %v979_v43, 0.0  ;;  %v987_v48 = vmax.f32 %v971_v41, 0.0  ;;  %v957_v24 = vadd.f32 %v941_v19, %v829_v33  ;;  %v949_v6 = vadd.f32 %v933_v29, %v821_v44 }
  0xcc   : > { %v1011_v38 = vmin.f32 %v995_v56, 6.0  ;;  %v1003_v50 = vmin.f32 %v987_v48, 6.0  ;;  %v980_v1 = vadd.f32 %v2218_v35, %v957_v24  ;;  %v972_v10 = vadd.f32 %v2218_v35, %v949_v6  ;;  %v1373_v35 = vld [vmem:[%s2525_s6] ss:$0 sm:$0xff] }
  0xce   : > { %v996_v49 = vmax.f32 %v980_v1, 0.0  ;;  %v988_v25 = vmax.f32 %v972_v10, 0.0  ;;  %1429 = vmatprep.mubr.msk.f32.mxu0 %vm1024_vm2, %v1003_v50  ;;  %1441 = vmatprep.mubr.msk.f32.mxu1 %vm1024_vm2, %v1011_v38 }
  0xd0   : > { %v1012_v53 = vmin.f32 %v996_v49, 6.0  ;;  %v1004_v3 = vmin.f32 %v988_v25, 6.0 }
  0xd2   : > { %1430 = vmatmul.mubr.msk.f32.gmra.mxu0 %vm1024_vm2, %v1004_v3  ;;  %1442 = vmatmul.mubr.msk.f32.gmra.mxu1 %vm1024_vm2, %v1012_v53 }
 0x162   : > { %v1422_v34 = vpop.f32.mrf.mxu0  ;;  %v1434_v2 = vpop.f32.mrf.mxu1 }
 0x163   : > { %v1145_v21 = vadd.f32 %v1422_v34, %v1373_v35  ;;  %v1185_v58 = vadd.f32 %v1434_v2, %v1373_v35 }
 0x164   : > { %v1139_v32 = vpop.f32.mrf.mxu0  ;;  %v1179_v12 = vpop.f32.mrf.mxu1 }
 0x165   : > { %1220 = vst.msk [vmem:[%s2470_s20 + $0x8] sm:$0xff] %vm1218_vm3, %v1145_v21  ;;  %1228 = vst.msk [vmem:[%s2470_s20 + $0x48] sm:$0xff] %vm1218_vm3, %v1185_v58  ;;  %v1140_v59 = vadd.f32 %v1373_v35, %v1139_v32  ;;  %v1180_v28 = vadd.f32 %v1373_v35, %v1179_v12 }
 0x167   : > { %1219 = vst.msk [vmem:[%s2470_s20] sm:$0xff] %vm1218_vm3, %v1140_v59  ;;  %1227 = vst.msk [vmem:[%s2470_s20 + $0x40] sm:$0xff] %vm1218_vm3, %v1180_v28 }
 0x172   : > { %v1425_v60 = vpop.f32.mrf.mxu0  ;;  %v1437_v54 = vpop.f32.mrf.mxu1 }
 0x173   : > { %v1155_v55 = vadd.f32 %v1425_v60, %v1373_v35  ;;  %v1195_v15 = vadd.f32 %v1437_v54, %v1373_v35 }
 0x174   : > { %v1149_v0 = vpop.f32.mrf.mxu0  ;;  %v1189_v27 = vpop.f32.mrf.mxu1 }
 0x175   : > { %1222 = vst.msk [vmem:[%s2470_s20 + $0x18] sm:$0xff] %vm1218_vm3, %v1155_v55  ;;  %1230 = vst.msk [vmem:[%s2470_s20 + $0x58] sm:$0xff] %vm1218_vm3, %v1195_v15  ;;  %v1150_v20 = vadd.f32 %v1373_v35, %v1149_v0  ;;  %v1190_v17 = vadd.f32 %v1373_v35, %v1189_v27 }
 0x177   : > { %1221 = vst.msk [vmem:[%s2470_s20 + $0x10] sm:$0xff] %vm1218_vm3, %v1150_v20  ;;  %1229 = vst.msk [vmem:[%s2470_s20 + $0x50] sm:$0xff] %vm1218_vm3, %v1190_v17 }
 0x182   : > { %v1428_v4 = vpop.f32.mrf.mxu0  ;;  %v1440_v61 = vpop.f32.mrf.mxu1 }
 0x183   : > { %v1165_v23 = vadd.f32 %v1428_v4, %v1373_v35  ;;  %v1205_v14 = vadd.f32 %v1440_v61, %v1373_v35 }
 0x184   : > { %v1159_v57 = vpop.f32.mrf.mxu0  ;;  %v1199_v11 = vpop.f32.mrf.mxu1 }
 0x185   : > { %1224 = vst.msk [vmem:[%s2470_s20 + $0x28] sm:$0xff] %vm1218_vm3, %v1165_v23  ;;  %1232 = vst.msk [vmem:[%s2470_s20 + $0x68] sm:$0xff] %vm1218_vm3, %v1205_v14  ;;  %v1160_v39 = vadd.f32 %v1373_v35, %v1159_v57  ;;  %v1200_v37 = vadd.f32 %v1373_v35, %v1199_v11 }
 0x187   : > { %1223 = vst.msk [vmem:[%s2470_s20 + $0x20] sm:$0xff] %vm1218_vm3, %v1160_v39  ;;  %1231 = vst.msk [vmem:[%s2470_s20 + $0x60] sm:$0xff] %vm1218_vm3, %v1200_v37 }
 0x192   : > { %v1431_v31 = vpop.f32.mrf.mxu0  ;;  %v1443_v5 = vpop.f32.mrf.mxu1 }
 0x193   : > { %v1175_v13 = vadd.f32 %v1431_v31, %v1373_v35  ;;  %v1215_v42 = vadd.f32 %v1443_v5, %v1373_v35 }
 0x194   : > { %v1169_v45 = vpop.f32.mrf.mxu0  ;;  %v1209_v40 = vpop.f32.mrf.mxu1 }
 0x195   : > { %1226 = vst.msk [vmem:[%s2470_s20 + $0x38] sm:$0xff] %vm1218_vm3, %v1175_v13  ;;  %1234 = vst.msk [vmem:[%s2470_s20 + $0x78] sm:$0xff] %vm1218_vm3, %v1215_v42  ;;  %v1170_v22 = vadd.f32 %v1373_v35, %v1169_v45  ;;  %v1210_v7 = vadd.f32 %v1373_v35, %v1209_v40 }
 0x197   : > { %1225 = vst.msk [vmem:[%s2470_s20 + $0x30] sm:$0xff] %vm1218_vm3, %v1170_v22  ;;  %1233 = vst.msk [vmem:[%s2470_s20 + $0x70] sm:$0xff] %vm1218_vm3, %v1210_v7 }
 0x198 PF: > { %s17_s28 = sadd.s32 1, %s1534_s28   ;;  %s2609_s24 = smov %s1526_s26 }
 0x199   : > { %p14_p7 = scmp.ge.s32.totalorder %s17_s28, 6   ;;  %s2610_s25 = smov %s1530_s27 }
 0x19a   : > { %s2611_s26 = smov %s2614_s29  ;;  %s2612_s27 = smov %s2618_s30 }
 0x19b   :  { %16 = sbr.rel (!%p14_p7) target bundleno = 3 (0x3), region = 81 }

</bundles_post_ra>
